<compile_context>
chip_gen: v5e
topology: v5e:2x2
jax: 0.10.0
libtpu: 0.0.40
codegen_flags: <defaults>
</compile_context>

<pallas_src>
import jax
import jax.numpy as jnp
from jax.experimental import pallas as pl
from jax.experimental.pallas import tpu as pltpu


def _round_up(x, m):
    return (x + m - 1) // m * m


def _pick_tb(batch, max_block_b):
    """Lane-dense batch tile; >= 2 blocks for large batches (v7x has 2 TCs)."""
    if batch <= 256:
        return _round_up(batch, 128)          # single block for small batches
    # Keep TB a multiple of 256 (v6e/v7x MXU is 256 lanes wide) and split the
    # batch over at least 2 blocks so both v7x TensorCores get work.
    half = -(-batch // 2)
    tb = _round_up(half, 256)
    return max(256, min(tb, _round_up(max_block_b, 256)))


def gmf_kernel(uid_ref, fid_ref, uio_ref, fio_ref, ut_ref, ft_ref, b_ref, o_ref):
    uid = uid_ref[...]                                   # (1, TB) int32
    fid = fid_ref[...]                                   # (1, TB) int32

    # One-hot selection via compare + cast against the resident column iotas
    # (no per-step iota generation, no select); 0/1 values are exact in bf16.
    u_sel = (uio_ref[...] == uid).astype(ut_ref.dtype)   # (U_pad, TB) bf16
    f_sel = (fio_ref[...] == fid).astype(ft_ref.dtype)   # (F_pad, TB) bf16

    # Vectorized gather from the resident transposed tables:
    #   (H, V_pad) @ (V_pad, TB) -> (H, TB), f32 accumulation on the MXU.
    u_emb = jnp.dot(ut_ref[...], u_sel, preferred_element_type=jnp.float32)
    f_emb = jnp.dot(ft_ref[...], f_sel, preferred_element_type=jnp.float32)

    # GMF product (fc1 weight already folded into the user table) + sublane
    # reduction + bias.
    # TODO(synk): F.dropout(u*f, 0.3) is stochastic; eval-mode identity is used
    # (a training-mode variant would use pltpu.prng_seed/prng_random_bits and
    #  scale kept elements by 1/(1-p)).
    o_ref[...] = jnp.sum(u_emb * f_emb, axis=0, keepdims=True) + b_ref[0, 0]


def gmf_forward(user, food, user_table, food_table, w, b, *, max_block_b=512):
    """GMF.forward(user, food): tables (U,H)/(F,H) f32, w (H,1), b (1,1)."""
    B = user.shape[0]
    U, H = user_table.shape
    F = food_table.shape[0]

    TB = _pick_tb(B, max_block_b)
    nb = -(-B // TB)
    B_pad = nb * TB

    # Pad index vectors (pad value 0 is a valid row; padded results are sliced
    # off) and give them a lane-dense (nb, TB) layout.
    uid = jnp.pad(user.astype(jnp.int32), (0, B_pad - B)).reshape(nb, TB)
    fid = jnp.pad(food.astype(jnp.int32), (0, B_pad - B)).reshape(nb, TB)

    U_pad = _round_up(U, 128)
    F_pad = _round_up(F, 128)

    # Fold fc1 weight into the user table (sum_h (u_h*w_h)*f_h == fc1(u*f)),
    # transpose (hidden on sublanes, vocab on lanes), pad vocab to a lane
    # multiple, cast to bf16.  The 0/1 one-hot gather itself stays exact; the
    # embeddings are bf16-rounded (documented approximation).
    w_row = jnp.asarray(w, jnp.float32).reshape(1, H)
    ut_T = jnp.pad((user_table.astype(jnp.float32) * w_row).T,
                   ((0, 0), (0, U_pad - U))).astype(jnp.bfloat16)
    ft_T = jnp.pad(food_table.astype(jnp.float32).T,
                   ((0, 0), (0, F_pad - F))).astype(jnp.bfloat16)

    # Resident column iotas for the in-kernel compare-based one-hot.
    iota_u = jnp.arange(U_pad, dtype=jnp.int32).reshape(U_pad, 1)
    iota_f = jnp.arange(F_pad, dtype=jnp.int32).reshape(F_pad, 1)

    bias = jnp.asarray(b, jnp.float32).reshape(1, 1)

    # VMEM budget sized against v7x's 64 MiB (also raises v5e's 16 MiB default
    # scoped limit as tables grow), with headroom for the (V_pad, TB) one-hot
    # intermediates and double-buffered per-step blocks.
    resident = 2 * H * (U_pad + F_pad) + 4 * (U_pad + F_pad)
    per_step = (2 * TB * 4 * 2                 # uid/fid blocks (double-buffered)
                + 2 * (U_pad + F_pad) * TB     # bf16 one-hot intermediates
                + 2 * H * TB * 4               # f32 gathered embeddings
                + TB * 4 * 2)                  # output block
    vmem_limit = int(min(64 << 20, max(8 << 20, 4 * (resident + per_step))))

    out_shape = jax.ShapeDtypeStruct((nb, TB), jnp.float32)

    # TODO(synk): for production vocab sizes (V_pad ~10k+ or tables nearing
    # ~25% of VMEM) switch to a scalar-prefetch + make_async_copy row-gather
    # with the tables left in HBM (memory_space=pl.ANY); the one-hot gather is
    # O(vocab) work per sample and only suits small vocabularies.

    def build_and_call(single_buffer_resident):
        res_kwargs = (
            dict(pipeline_mode=pl.Buffered(1)) if single_buffer_resident else {})

        def resident_spec(shape):
            # Constant index_map => copied once and reused every grid step.
            return pl.BlockSpec(shape, lambda i: (0,) * len(shape), **res_kwargs)

        grid_spec = pltpu.PrefetchScalarGridSpec(
            num_scalar_prefetch=0,
            grid=(nb,),
            in_specs=[
                pl.BlockSpec((1, TB), lambda i: (i, 0)),            # uid
                pl.BlockSpec((1, TB), lambda i: (i, 0)),            # fid
                resident_spec((U_pad, 1)),                          # user iota
                resident_spec((F_pad, 1)),                          # food iota
                resident_spec((H, U_pad)),                          # user tbl^T * w
                resident_spec((H, F_pad)),                          # food tbl^T
                pl.BlockSpec(memory_space=pltpu.MemorySpace.SMEM),  # bias
            ],
            out_specs=pl.BlockSpec((1, TB), lambda i: (i, 0)),
        )
        return pl.pallas_call(
            gmf_kernel,
            out_shape=out_shape,
            grid_spec=grid_spec,
            compiler_params=pltpu.CompilerParams(
                dimension_semantics=("parallel",),
                vmem_limit_bytes=vmem_limit,
            ),
        )(uid, fid, iota_u, iota_f, ut_T, ft_T, bias)

    try:
        # Single-buffer the resident blocks (they are only copied once).
        out = build_and_call(True)
    except Exception:
        # pipeline_mode / Buffered(1) unsupported on this jax/libtpu: fall back
        # to default double-buffered resident blocks (correctness unchanged).
        out = build_and_call(False)

    # PyTorch: x.squeeze()  — (B, 1) -> (B,)
    return out.reshape(B_pad)[:B]


if __name__ == "__main__":
    user_size, food_size, hidden, batch = 20, 30, 32, 8

    key = jax.random.PRNGKey(0)
    k1, k2, k3, k4, k5, k6 = jax.random.split(key, 6)

    # Deterministic synthetic parameters (shapes match nn.Embedding / nn.Linear).
    user_table = jax.random.normal(k1, (user_size, hidden), jnp.float32) * 0.1
    food_table = jax.random.normal(k2, (food_size, hidden), jnp.float32) * 0.1
    # nn.Embedding(padding_idx=0): row 0 initialized to zeros.
    user_table = user_table.at[0].set(0.0)
    food_table = food_table.at[0].set(0.0)

    w = jax.random.normal(k3, (hidden, 1), jnp.float32) * 0.1   # fc1.weight.T
    b = jax.random.normal(k4, (1, 1), jnp.float32) * 0.1        # fc1.bias

    user = jax.random.randint(k5, (batch,), 0, user_size, jnp.int32)
    food = jax.random.randint(k6, (batch,), 0, food_size, jnp.int32)

    out = jax.block_until_ready(
        gmf_forward(user, food, user_table, food_table, w, b))

    # Plain-JAX f32 reference (eval-mode dropout == identity).
    u = user_table[user]
    f = food_table[food]
    ref = jnp.sum(u * f * w.reshape(1, hidden), axis=-1) + b[0, 0]

    assert out.shape == (batch,), out.shape
    # Tables (and the folded user_table * w) are bf16 inside the kernel, so
    # agreement with the f32 reference is to bf16 precision.
    assert jnp.allclose(out, ref, rtol=2e-2, atol=2e-3), (out, ref)

    print("KERNEL_OK")
</pallas_src>

<mosaic_0001>
module attributes {stable_mosaic.version = 11 : i64} {
  func.func @gmf_kernel(%arg0: i32, %arg1: memref<1x128xi32, #tpu.memory_space<vmem>>, %arg2: memref<1x128xi32, #tpu.memory_space<vmem>>, %arg3: memref<128x1xi32, #tpu.memory_space<vmem>>, %arg4: memref<128x1xi32, #tpu.memory_space<vmem>>, %arg5: memref<32x128xbf16, #tpu.memory_space<vmem>>, %arg6: memref<32x128xbf16, #tpu.memory_space<vmem>>, %arg7: memref<1x1xf32, #tpu.memory_space<smem>>, %arg8: memref<1x128xf32, #tpu.memory_space<vmem>>) attributes {dimension_semantics = [#tpu.dimension_semantics<parallel>], iteration_bounds = array<i64: 1>, scalar_prefetch = 0 : i64, scratch_operands = 0 : i64, tpu.core_type = #tpu.core_type<tc>, window_params = [{transform_indices = @transform_0, window_bounds = array<i64: 1, 128>}, {transform_indices = @transform_1, window_bounds = array<i64: 1, 128>}, {pipeline_mode = #tpu.pipeline_mode<synchronous>, transform_indices = @transform_2, window_bounds = array<i64: 128, 1>}, {pipeline_mode = #tpu.pipeline_mode<synchronous>, transform_indices = @transform_3, window_bounds = array<i64: 128, 1>}, {pipeline_mode = #tpu.pipeline_mode<synchronous>, transform_indices = @transform_4, window_bounds = array<i64: 32, 128>}, {pipeline_mode = #tpu.pipeline_mode<synchronous>, transform_indices = @transform_5, window_bounds = array<i64: 32, 128>}, {transform_indices = @transform_6, window_bounds = array<i64: 1, 1>}, {transform_indices = @transform_7, window_bounds = array<i64: 1, 128>}]} {
    %c0 = arith.constant 0 : index
    %c0_0 = arith.constant 0 : index
    %0 = vector.load %arg1[%c0, %c0_0] : memref<1x128xi32, #tpu.memory_space<vmem>>, vector<1x128xi32>
    %c0_1 = arith.constant 0 : index
    %c0_2 = arith.constant 0 : index
    %1 = vector.load %arg2[%c0_1, %c0_2] : memref<1x128xi32, #tpu.memory_space<vmem>>, vector<1x128xi32>
    %c0_3 = arith.constant 0 : index
    %c0_4 = arith.constant 0 : index
    %2 = vector.load %arg3[%c0_3, %c0_4] : memref<128x1xi32, #tpu.memory_space<vmem>>, vector<128x1xi32>
    %3 = vector.broadcast %2 : vector<128x1xi32> to vector<128x128xi32>
    %4 = vector.broadcast %0 : vector<1x128xi32> to vector<128x128xi32>
    %5 = arith.cmpi eq, %3, %4 : vector<128x128xi32>
    %6 = arith.extui %5 : vector<128x128xi1> to vector<128x128xi32>
    %7 = arith.sitofp %6 : vector<128x128xi32> to vector<128x128xf32>
    %8 = arith.truncf %7 : vector<128x128xf32> to vector<128x128xbf16>
    %c0_5 = arith.constant 0 : index
    %c0_6 = arith.constant 0 : index
    %9 = vector.load %arg4[%c0_5, %c0_6] : memref<128x1xi32, #tpu.memory_space<vmem>>, vector<128x1xi32>
    %10 = vector.broadcast %9 : vector<128x1xi32> to vector<128x128xi32>
    %11 = vector.broadcast %1 : vector<1x128xi32> to vector<128x128xi32>
    %12 = arith.cmpi eq, %10, %11 : vector<128x128xi32>
    %13 = arith.extui %12 : vector<128x128xi1> to vector<128x128xi32>
    %14 = arith.sitofp %13 : vector<128x128xi32> to vector<128x128xf32>
    %15 = arith.truncf %14 : vector<128x128xf32> to vector<128x128xbf16>
    %c0_7 = arith.constant 0 : index
    %c0_8 = arith.constant 0 : index
    %16 = vector.load %arg5[%c0_7, %c0_8] : memref<32x128xbf16, #tpu.memory_space<vmem>>, vector<32x128xbf16>
    %cst = arith.constant dense<0.000000e+00> : vector<32x128xf32>
    %17 = tpu.matmul %16, %8, %cst {dimension_numbers = #tpu.dot_dimension_numbers<[1], [0], [0], [1], [0, 0, 1, 1], [], []>} : vector<32x128xbf16>, vector<128x128xbf16>, vector<32x128xf32> -> vector<32x128xf32>
    %c0_9 = arith.constant 0 : index
    %c0_10 = arith.constant 0 : index
    %18 = vector.load %arg6[%c0_9, %c0_10] : memref<32x128xbf16, #tpu.memory_space<vmem>>, vector<32x128xbf16>
    %cst_11 = arith.constant dense<0.000000e+00> : vector<32x128xf32>
    %19 = tpu.matmul %18, %15, %cst_11 {dimension_numbers = #tpu.dot_dimension_numbers<[1], [0], [0], [1], [0, 0, 1, 1], [], []>} : vector<32x128xbf16>, vector<128x128xbf16>, vector<32x128xf32> -> vector<32x128xf32>
    %20 = arith.mulf %17, %19 : vector<32x128xf32>
    %cst_12 = arith.constant dense<0.000000e+00> : vector<128xf32>
    %21 = vector.multi_reduction <add>, %20, %cst_12 [0] : vector<32x128xf32> to vector<128xf32>
    %22 = vector.shape_cast %21 : vector<128xf32> to vector<1x128xf32>
    %c0_13 = arith.constant 0 : index
    %c0_14 = arith.constant 0 : index
    %23 = memref.load %arg7[%c0_13, %c0_14] : memref<1x1xf32, #tpu.memory_space<smem>>
    %24 = vector.broadcast %23 : f32 to vector<1x128xf32>
    %25 = arith.addf %22, %24 : vector<1x128xf32>
    %c0_15 = arith.constant 0 : index
    %c0_16 = arith.constant 0 : index
    %26 = vector.load %arg8[%c0_15, %c0_16] : memref<1x128xf32, #tpu.memory_space<vmem>>, vector<1x128xf32>
    tpu.vector_store %arg8[%c0_15, %c0_16], %25 {strides = array<i32>} : memref<1x128xf32, #tpu.memory_space<vmem>>, vector<1x128xf32>,
    return
  }
  func.func @transform_0(%arg0: i32) -> (i32, i32) {
    %c0_i32 = arith.constant 0 : i32
    %c0_i32_0 = arith.constant 0 : i32
    return %arg0, %c0_i32 : i32, i32
  }
  func.func @transform_1(%arg0: i32) -> (i32, i32) {
    %c0_i32 = arith.constant 0 : i32
    %c0_i32_0 = arith.constant 0 : i32
    return %arg0, %c0_i32 : i32, i32
  }
  func.func @transform_2(%arg0: i32) -> (i32, i32) {
    %c0_i32 = arith.constant 0 : i32
    %c0_i32_0 = arith.constant 0 : i32
    %c0_i32_1 = arith.constant 0 : i32
    return %c0_i32, %c0_i32_0 : i32, i32
  }
  func.func @transform_3(%arg0: i32) -> (i32, i32) {
    %c0_i32 = arith.constant 0 : i32
    %c0_i32_0 = arith.constant 0 : i32
    %c0_i32_1 = arith.constant 0 : i32
    return %c0_i32, %c0_i32_0 : i32, i32
  }
  func.func @transform_4(%arg0: i32) -> (i32, i32) {
    %c0_i32 = arith.constant 0 : i32
    %c0_i32_0 = arith.constant 0 : i32
    %c0_i32_1 = arith.constant 0 : i32
    return %c0_i32, %c0_i32_0 : i32, i32
  }
  func.func @transform_5(%arg0: i32) -> (i32, i32) {
    %c0_i32 = arith.constant 0 : i32
    %c0_i32_0 = arith.constant 0 : i32
    %c0_i32_1 = arith.constant 0 : i32
    return %c0_i32, %c0_i32_0 : i32, i32
  }
  func.func @transform_6(%arg0: i32) -> (i32, i32) {
    %c0_i32 = arith.constant 0 : i32
    %c0_i32_0 = arith.constant 0 : i32
    %c0_i32_1 = arith.constant 0 : i32
    return %c0_i32, %c0_i32_0 : i32, i32
  }
  func.func @transform_7(%arg0: i32) -> (i32, i32) {
    %c0_i32 = arith.constant 0 : i32
    %c0_i32_0 = arith.constant 0 : i32
    return %arg0, %c0_i32 : i32, i32
  }
}

module attributes {stable_mosaic.version = 11 : i64} {
  func.func @gmf_kernel(%arg0: i32, %arg1: memref<1x128xi32, #tpu.memory_space<vmem>>, %arg2: memref<1x128xi32, #tpu.memory_space<vmem>>, %arg3: memref<128x1xi32, #tpu.memory_space<vmem>>, %arg4: memref<128x1xi32, #tpu.memory_space<vmem>>, %arg5: memref<32x128xbf16, #tpu.memory_space<vmem>>, %arg6: memref<32x128xbf16, #tpu.memory_space<vmem>>, %arg7: memref<1x1xf32, #tpu.memory_space<smem>>, %arg8: memref<1x128xf32, #tpu.memory_space<vmem>>) attributes {dimension_semantics = [#tpu.dimension_semantics<parallel>], iteration_bounds = array<i64: 1>, scalar_prefetch = 0 : i64, scratch_operands = 0 : i64, tpu.core_type = #tpu.core_type<tc>, window_params = [{transform_indices = @transform_0, window_bounds = array<i64: 1, 128>}, {transform_indices = @transform_1, window_bounds = array<i64: 1, 128>}, {pipeline_mode = #tpu.pipeline_mode<synchronous>, transform_indices = @transform_2, window_bounds = array<i64: 128, 1>}, {pipeline_mode = #tpu.pipeline_mode<synchronous>, transform_indices = @transform_3, window_bounds = array<i64: 128, 1>}, {pipeline_mode = #tpu.pipeline_mode<synchronous>, transform_indices = @transform_4, window_bounds = array<i64: 32, 128>}, {pipeline_mode = #tpu.pipeline_mode<synchronous>, transform_indices = @transform_5, window_bounds = array<i64: 32, 128>}, {transform_indices = @transform_6, window_bounds = array<i64: 1, 1>}, {transform_indices = @transform_7, window_bounds = array<i64: 1, 128>}]} {
    %c0 = arith.constant 0 : index
    %c0_0 = arith.constant 0 : index
    %0 = vector.load %arg1[%c0, %c0_0] : memref<1x128xi32, #tpu.memory_space<vmem>>, vector<1x128xi32>
    %c0_1 = arith.constant 0 : index
    %c0_2 = arith.constant 0 : index
    %1 = vector.load %arg2[%c0_1, %c0_2] : memref<1x128xi32, #tpu.memory_space<vmem>>, vector<1x128xi32>
    %c0_3 = arith.constant 0 : index
    %c0_4 = arith.constant 0 : index
    %2 = vector.load %arg3[%c0_3, %c0_4] : memref<128x1xi32, #tpu.memory_space<vmem>>, vector<128x1xi32>
    %3 = vector.broadcast %2 : vector<128x1xi32> to vector<128x128xi32>
    %4 = vector.broadcast %0 : vector<1x128xi32> to vector<128x128xi32>
    %5 = arith.cmpi eq, %3, %4 : vector<128x128xi32>
    %6 = arith.extui %5 : vector<128x128xi1> to vector<128x128xi32>
    %7 = arith.sitofp %6 : vector<128x128xi32> to vector<128x128xf32>
    %8 = arith.truncf %7 : vector<128x128xf32> to vector<128x128xbf16>
    %c0_5 = arith.constant 0 : index
    %c0_6 = arith.constant 0 : index
    %9 = vector.load %arg4[%c0_5, %c0_6] : memref<128x1xi32, #tpu.memory_space<vmem>>, vector<128x1xi32>
    %10 = vector.broadcast %9 : vector<128x1xi32> to vector<128x128xi32>
    %11 = vector.broadcast %1 : vector<1x128xi32> to vector<128x128xi32>
    %12 = arith.cmpi eq, %10, %11 : vector<128x128xi32>
    %13 = arith.extui %12 : vector<128x128xi1> to vector<128x128xi32>
    %14 = arith.sitofp %13 : vector<128x128xi32> to vector<128x128xf32>
    %15 = arith.truncf %14 : vector<128x128xf32> to vector<128x128xbf16>
    %c0_7 = arith.constant 0 : index
    %c0_8 = arith.constant 0 : index
    %16 = vector.load %arg5[%c0_7, %c0_8] : memref<32x128xbf16, #tpu.memory_space<vmem>>, vector<32x128xbf16>
    %cst = arith.constant dense<0.000000e+00> : vector<32x128xf32>
    %17 = tpu.matmul %16, %8, %cst {dimension_numbers = #tpu.dot_dimension_numbers<[1], [0], [0], [1], [0, 0, 1, 1], [], []>} : vector<32x128xbf16>, vector<128x128xbf16>, vector<32x128xf32> -> vector<32x128xf32>
    %c0_9 = arith.constant 0 : index
    %c0_10 = arith.constant 0 : index
    %18 = vector.load %arg6[%c0_9, %c0_10] : memref<32x128xbf16, #tpu.memory_space<vmem>>, vector<32x128xbf16>
    %cst_11 = arith.constant dense<0.000000e+00> : vector<32x128xf32>
    %19 = tpu.matmul %18, %15, %cst_11 {dimension_numbers = #tpu.dot_dimension_numbers<[1], [0], [0], [1], [0, 0, 1, 1], [], []>} : vector<32x128xbf16>, vector<128x128xbf16>, vector<32x128xf32> -> vector<32x128xf32>
    %20 = arith.mulf %17, %19 : vector<32x128xf32>
    %cst_12 = arith.constant dense<0.000000e+00> : vector<128xf32>
    %21 = vector.multi_reduction <add>, %20, %cst_12 [0] : vector<32x128xf32> to vector<128xf32>
    %22 = vector.shape_cast %21 : vector<128xf32> to vector<1x128xf32>
    %c0_13 = arith.constant 0 : index
    %c0_14 = arith.constant 0 : index
    %23 = memref.load %arg7[%c0_13, %c0_14] : memref<1x1xf32, #tpu.memory_space<smem>>
    %24 = vector.broadcast %23 : f32 to vector<1x128xf32>
    %25 = arith.addf %22, %24 : vector<1x128xf32>
    %c0_15 = arith.constant 0 : index
    %c0_16 = arith.constant 0 : index
    %26 = vector.load %arg8[%c0_15, %c0_16] : memref<1x128xf32, #tpu.memory_space<vmem>>, vector<1x128xf32>
    tpu.vector_store %arg8[%c0_15, %c0_16], %25 {strides = array<i32>} : memref<1x128xf32, #tpu.memory_space<vmem>>, vector<1x128xf32>,
    return
  }
  func.func @transform_0(%arg0: i32) -> (i32, i32) {
    %c0_i32 = arith.constant 0 : i32
    %c0_i32_0 = arith.constant 0 : i32
    return %arg0, %c0_i32 : i32, i32
  }
  func.func @transform_1(%arg0: i32) -> (i32, i32) {
    %c0_i32 = arith.constant 0 : i32
    %c0_i32_0 = arith.constant 0 : i32
    return %arg0, %c0_i32 : i32, i32
  }
  func.func @transform_2(%arg0: i32) -> (i32, i32) {
    %c0_i32 = arith.constant 0 : i32
    %c0_i32_0 = arith.constant 0 : i32
    %c0_i32_1 = arith.constant 0 : i32
    return %c0_i32, %c0_i32_0 : i32, i32
  }
  func.func @transform_3(%arg0: i32) -> (i32, i32) {
    %c0_i32 = arith.constant 0 : i32
    %c0_i32_0 = arith.constant 0 : i32
    %c0_i32_1 = arith.constant 0 : i32
    return %c0_i32, %c0_i32_0 : i32, i32
  }
  func.func @transform_4(%arg0: i32) -> (i32, i32) {
    %c0_i32 = arith.constant 0 : i32
    %c0_i32_0 = arith.constant 0 : i32
    %c0_i32_1 = arith.constant 0 : i32
    return %c0_i32, %c0_i32_0 : i32, i32
  }
  func.func @transform_5(%arg0: i32) -> (i32, i32) {
    %c0_i32 = arith.constant 0 : i32
    %c0_i32_0 = arith.constant 0 : i32
    %c0_i32_1 = arith.constant 0 : i32
    return %c0_i32, %c0_i32_0 : i32, i32
  }
  func.func @transform_6(%arg0: i32) -> (i32, i32) {
    %c0_i32 = arith.constant 0 : i32
    %c0_i32_0 = arith.constant 0 : i32
    %c0_i32_1 = arith.constant 0 : i32
    return %c0_i32, %c0_i32_0 : i32, i32
  }
  func.func @transform_7(%arg0: i32) -> (i32, i32) {
    %c0_i32 = arith.constant 0 : i32
    %c0_i32_0 = arith.constant 0 : i32
    return %arg0, %c0_i32 : i32, i32
  }
}

</mosaic_0001>

<bundles_post_ra>
// kernel: tpu_custom_call.1
= control target key start
LH: loop header
LB: loop body
LE: loop exit
PB: predicated region body
PF: predicated region fallthrough
CT: control target
= control target key end

     0   :  { %v509_v3 = vmov 0   ;;  %s740_s0 = inlined_call_operand.vmem [shape: s32[1,128], index: 0, kind: input, shape index: {}]   ;;  %s741_s1 = inlined_call_operand.vmem [shape: s32[1,128], index: 1, kind: input, shape index: {}]   ;;  %s742_s2 = inlined_call_operand.vmem [shape: s32[128,1], index: 2, kind: input, shape index: {}]   ;;  %s743_s3 = inlined_call_operand.vmem [shape: s32[128,1], index: 3, kind: input, shape index: {}]   ;;  %s744_s4 = inlined_call_operand.vmem [shape: bf16[32,128], index: 4, kind: input, shape index: {}]   ;;  %s745_s5 = inlined_call_operand.vmem [shape: bf16[32,128], index: 5, kind: input, shape index: {}]   ;;  %s746_s6 = inlined_call_operand.<no memory space> [shape: f32[1,1], index: 6, kind: input, shape index: {}]   ;;  %s747_s7 = inlined_call_operand.hbm [shape: f32[1,128], index: 7, kind: output, shape index: {}]  }
   0x1   :  { %v165_v0 = vld [vmem:[%s743_s3 + $0x70] sm:$0xff]  ;;  %v42_v2 = vld [vmem:[%s742_s2 + $0x60] sm:$0xff]  ;;  %480 = vset.pattern.permute.xlu2 %v509_v3  ;;  %479 = vset.pattern.permute.xlu1 %v509_v3 }
   0x2   :  { %v44_v1 = vld [vmem:[%s742_s2 + $0x70] sm:$0xff]  ;;  %478 = vset.pattern.permute.xlu0 %v509_v3  ;;  %210 = vperm.xlu1 %479, %v165_v0  }
   0x3   :  { %89 = vperm.xlu0 %478, %v44_v1   ;;  %83 = vperm.xlu2 %480, %v42_v2  }
   0x4   :  { %13 = vsyncpa [#allocation4], 0  ;;  %v166_v4 = vld [vmem:[%s743_s3 + $0x78] sm:$0xff]  ;;  %v43_v6 = vld [vmem:[%s742_s2 + $0x68] sm:$0xff]  ;;  %v510_v43 = vmov 1.0|1.0  }
   0x5   :  { %v45_v5 = vld [vmem:[%s742_s2 + $0x78] sm:$0xff]  ;;  %v164_v7 = vld [vmem:[%s743_s3 + $0x68] sm:$0xff]  ;;  %v163_v8 = vld [vmem:[%s743_s3 + $0x60] sm:$0xff]  ;;  %s511_s27 = smov [#allocation3]   ;;  %s366_s8 = sshll.u32 %s747_s7, 4  ;;  %s367_s8 = int_to_ptr.hbm [resolvable:$true] %s366_s8 }
   0x6   :  { %v40_v9 = vld [vmem:[%s742_s2 + $0x50] sm:$0xff]  ;;  %v41_v11 = vld [vmem:[%s742_s2 + $0x58] sm:$0xff]  ;;  %v39_v13 = vld [vmem:[%s742_s2 + $0x48] sm:$0xff]  ;;  %s364_s28 = sshll.u32 %s511_s27, 4  ;;  %s365_s28 = int_to_ptr.vmem [resolvable:$true] %s364_s28 }
   0x7   :  { %v161_v10 = vld [vmem:[%s743_s3 + $0x50] sm:$0xff]  ;;  %v162_v12 = vld [vmem:[%s743_s3 + $0x58] sm:$0xff]  ;;  %v159_v14 = vld [vmem:[%s743_s3 + $0x40] sm:$0xff] }
   0x8   :  { %v38_v15 = vld [vmem:[%s742_s2 + $0x40] sm:$0xff]  ;;  %v36_v16 = vld [vmem:[%s742_s2 + $0x30] sm:$0xff]  ;;  %v160_v17 = vld [vmem:[%s743_s3 + $0x48] sm:$0xff] }
   0x9   :  { %v37_v18 = vld [vmem:[%s742_s2 + $0x38] sm:$0xff]  ;;  %v157_v20 = vld [vmem:[%s743_s3 + $0x30] sm:$0xff]  ;;  %v34_v21 = vld [vmem:[%s742_s2 + $0x20] sm:$0xff] }
   0xa   :  { %213 = vperm.xlu1 %479, %v166_v4   ;;  %v158_v19 = vld [vmem:[%s743_s3 + $0x38] sm:$0xff]  ;;  %v155_v22 = vld [vmem:[%s743_s3 + $0x20] sm:$0xff]  ;;  %v35_v23 = vld [vmem:[%s742_s2 + $0x28] sm:$0xff] }
   0xb   :  { %92 = vperm.xlu0 %478, %v45_v5   ;;  %86 = vperm.xlu2 %480, %v43_v6   ;;  %v156_v24 = vld [vmem:[%s743_s3 + $0x28] sm:$0xff]  ;;  %v33_v25 = vld [vmem:[%s742_s2 + $0x18] sm:$0xff]  ;;  %v153_v26 = vld [vmem:[%s743_s3 + $0x10] sm:$0xff] }
   0xc   :  { %v32_v27 = vld [vmem:[%s742_s2 + $0x10] sm:$0xff]  ;;  %v30_v28 = vld [vmem:[%s742_s2] sm:$0xff]  ;;  %v154_v29 = vld [vmem:[%s743_s3 + $0x18] sm:$0xff] }
   0xd   :  { %v31_v30 = vld [vmem:[%s742_s2 + $0x8] sm:$0xff]  ;;  %v151_v32 = vld [vmem:[%s743_s3] sm:$0xff] }
   0xe   :  { %v152_v31 = vld [vmem:[%s743_s3 + $0x8] sm:$0xff]  ;;  %v651_v38 = vld [vmem:[%s741_s1] ss:$0 sm:$0xff] }
   0xf   :  { %v656_v39 = vld [vmem:[%s740_s0] ss:$0 sm:$0xff]  ;;  %v456_v2 = vld [vmem:[%s744_s4 + $0x8] sm:$0xff] }
  0x10   :  { %v455_v3 = vld [vmem:[%s744_s4] sm:$0xff] }
  0x11   :  { %v457_v6 = vld [vmem:[%s745_s5] sm:$0xff] }
  0x12   :  { %207 = vperm.xlu1 %479, %v164_v7   ;;  %v458_v7 = vld [vmem:[%s745_s5 + $0x8] sm:$0xff] }
  0x13   :  { %204 = vperm.xlu0 %478, %v163_v8   ;;  %77 = vperm.xlu2 %480, %v40_v9  }
  0x1a   :  { %198 = vperm.xlu1 %479, %v161_v10  }
  0x1b   :  { %80 = vperm.xlu0 %478, %v41_v11   ;;  %201 = vperm.xlu2 %480, %v162_v12  }
  0x22   :  { %74 = vperm.xlu1 %479, %v39_v13  }
  0x23   :  { %192 = vperm.xlu2 %480, %v159_v14   ;;  %71 = vperm.xlu0 %478, %v38_v15  }
  0x2a   :  { %65 = vperm.xlu1 %479, %v36_v16  }
  0x2b   :  { %195 = vperm.xlu0 %478, %v160_v17   ;;  %68 = vperm.xlu2 %480, %v37_v18  }
  0x32   :  { %189 = vperm.xlu1 %479, %v158_v19  }
  0x33   :  { %186 = vperm.xlu0 %478, %v157_v20   ;;  %59 = vperm.xlu2 %480, %v34_v21  }
  0x3a   :  { %180 = vperm.xlu1 %479, %v155_v22  }
  0x3b   :  { %62 = vperm.xlu0 %478, %v35_v23   ;;  %183 = vperm.xlu2 %480, %v156_v24  }
  0x42   :  { %56 = vperm.xlu1 %479, %v33_v25  }
  0x43   :  { %174 = vperm.xlu2 %480, %v153_v26   ;;  %53 = vperm.xlu0 %478, %v32_v27  }
  0x4a   :  { %47 = vperm.xlu1 %479, %v30_v28   ;;  %v356_v28 = vstv %s746_s6 }
  0x4b   :  { %177 = vperm.xlu0 %478, %v154_v29   ;;  %50 = vperm.xlu2 %480, %v31_v30  }
  0x52   :  { %171 = vperm.xlu1 %479, %v152_v31  }
  0x53   :  { %168 = vperm.xlu0 %478, %v151_v32  }
  0x5d   :  { %v84_v33 = vpop.permute.xlu2 %83 }
  0x5e   :  { %vm107_vm6 = vcmp.eq.s32.totalorder %v84_v33, %v656_v39 }
  0x65   :  { %v87_v34 = vpop.permute.xlu2 %86 }
  0x66   :  { %vm108_vm7 = vcmp.eq.s32.totalorder %v87_v34, %v656_v39 }
  0x67   :  { %vm417_vm8 = vmpackc.low %vm108_vm7, %vm107_vm6 }
  0x6d   :  { %v78_v35 = vpop.permute.xlu2 %77 }
  0x6e   :  { %vm105_vm14 = vcmp.eq.s32.totalorder %v78_v35, %v656_v39 }
  0x74   :  { %v211_v36 = vpop.permute.xlu1 %210 }
  0x75   :  { %v90_v37 = vpop.permute.xlu0 %89  ;;  %vm230_vm0 = vcmp.eq.s32.totalorder %v211_v36, %v651_v38  ;;  %v202_v42 = vpop.permute.xlu2 %201 }
  0x76   :  { %vm109_vm2 = vcmp.eq.s32.totalorder %v90_v37, %v656_v39  ;;  %vm227_vm12 = vcmp.eq.s32.totalorder %v202_v42, %v651_v38 }
  0x7c   :  { %v214_v40 = vpop.permute.xlu1 %213 }
  0x7d   :  { %vm231_vm1 = vcmp.eq.s32.totalorder %v214_v40, %v651_v38  ;;  %v93_v41 = vpop.permute.xlu0 %92  ;;  %v193_v46 = vpop.permute.xlu2 %192 }
  0x7e   :  { %vm110_vm3 = vcmp.eq.s32.totalorder %v93_v41, %v656_v39  ;;  %vm439_vm4 = vmpackc.low %vm231_vm1, %vm230_vm0  ;;  %vm224_vm7 = vcmp.eq.s32.totalorder %v193_v46, %v651_v38 }
  0x7f   :  { %vm415_vm5 = vmpackc.low %vm110_vm3, %vm109_vm2  ;;  %440 = vmatpush.bf16.msk.msra.mxu1 %vm439_vm4, %v510_v43  ;;  %467 = vmatpush.bf16.msk.msra.mxu3 %vm439_vm4, %v510_v43 }
  0x80   :  { %416 = vmatpush.bf16.msk.msra.mxu0 %vm415_vm5, %v510_v43  ;;  %459 = vmatpush.bf16.msk.msra.mxu2 %vm415_vm5, %v510_v43 }
  0x84   :  { %418 = vmatpush.bf16.msk.msra.mxu0 %vm417_vm8, %v510_v43  ;;  %460 = vmatpush.bf16.msk.msra.mxu2 %vm417_vm8, %v510_v43  ;;  %v208_v44 = vpop.permute.xlu1 %207 }
  0x85   :  { %vm229_vm9 = vcmp.eq.s32.totalorder %v208_v44, %v651_v38  ;;  %v205_v45 = vpop.permute.xlu0 %204  ;;  %v69_v49 = vpop.permute.xlu2 %68 }
  0x86   :  { %vm228_vm10 = vcmp.eq.s32.totalorder %v205_v45, %v651_v38  ;;  %vm102_vm5 = vcmp.eq.s32.totalorder %v69_v49, %v656_v39 }
  0x87   :  { %vm441_vm11 = vmpackc.low %vm229_vm9, %vm228_vm10 }
  0x88   :  { %442 = vmatpush.bf16.msk.msra.mxu1 %vm441_vm11, %v510_v43  ;;  %468 = vmatpush.bf16.msk.msra.mxu3 %vm441_vm11, %v510_v43 }
  0x8c   :  { %v199_v47 = vpop.permute.xlu1 %198 }
  0x8d   :  { %vm226_vm13 = vcmp.eq.s32.totalorder %v199_v47, %v651_v38  ;;  %v81_v48 = vpop.permute.xlu0 %80  ;;  %v60_v52 = vpop.permute.xlu2 %59 }
  0x8e   :  { %vm443_vm15 = vmpackc.low %vm227_vm12, %vm226_vm13  ;;  %vm106_vm0 = vcmp.eq.s32.totalorder %v81_v48, %v656_v39 }
  0x8f   :  { %vm419_vm1 = vmpackc.low %vm106_vm0, %vm105_vm14  ;;  %444 = vmatpush.bf16.msk.msra.mxu1 %vm443_vm15, %v510_v43  ;;  %469 = vmatpush.bf16.msk.msra.mxu3 %vm443_vm15, %v510_v43  ;;  %vm99_vm0 = vcmp.eq.s32.totalorder %v60_v52, %v656_v39 }
  0x90   :  { %420 = vmatpush.bf16.msk.msra.mxu0 %vm419_vm1, %v510_v43  ;;  %461 = vmatpush.bf16.msk.msra.mxu2 %vm419_vm1, %v510_v43 }
  0x94   :  { %v75_v50 = vpop.permute.xlu1 %74 }
  0x95   :  { %vm104_vm2 = vcmp.eq.s32.totalorder %v75_v50, %v656_v39  ;;  %v72_v51 = vpop.permute.xlu0 %71  ;;  %v184_v57 = vpop.permute.xlu2 %183 }
  0x96   :  { %vm103_vm3 = vcmp.eq.s32.totalorder %v72_v51, %v656_v39  ;;  %vm221_vm14 = vcmp.eq.s32.totalorder %v184_v57, %v651_v38 }
  0x97   :  { %vm421_vm4 = vmpackc.low %vm104_vm2, %vm103_vm3 }
  0x98   :  { %422 = vmatpush.bf16.msk.msra.mxu0 %vm421_vm4, %v510_v43  ;;  %462 = vmatpush.bf16.msk.msra.mxu2 %vm421_vm4, %v510_v43 }
  0x9c   :  { %v66_v53 = vpop.permute.xlu1 %65 }
  0x9d   :  { %v196_v54 = vpop.permute.xlu0 %195  ;;  %vm101_vm6 = vcmp.eq.s32.totalorder %v66_v53, %v656_v39  ;;  %v175_v60 = vpop.permute.xlu2 %174 }
  0x9e   :  { %vm225_vm8 = vcmp.eq.s32.totalorder %v196_v54, %v651_v38  ;;  %vm423_vm9 = vmpackc.low %vm102_vm5, %vm101_vm6 }
  0x9f   :  { %vm445_vm10 = vmpackc.low %vm225_vm8, %vm224_vm7  ;;  %424 = vmatpush.bf16.msk.msra.mxu0 %vm423_vm9, %v510_v43  ;;  %463 = vmatpush.bf16.msk.msra.mxu2 %vm423_vm9, %v510_v43  ;;  %vm218_vm9 = vcmp.eq.s32.totalorder %v175_v60, %v651_v38 }
  0xa0   :  { %446 = vmatpush.bf16.msk.msra.mxu1 %vm445_vm10, %v510_v43  ;;  %470 = vmatpush.bf16.msk.msra.mxu3 %vm445_vm10, %v510_v43 }
  0xa4   :  { %v190_v55 = vpop.permute.xlu1 %189 }
  0xa5   :  { %v187_v56 = vpop.permute.xlu0 %186  ;;  %vm223_vm11 = vcmp.eq.s32.totalorder %v190_v55, %v651_v38  ;;  %v51_v63 = vpop.permute.xlu2 %50 }
  0xa6   :  { %vm222_vm12 = vcmp.eq.s32.totalorder %v187_v56, %v651_v38  ;;  %vm96_vm7 = vcmp.eq.s32.totalorder %v51_v63, %v656_v39 }
  0xa7   :  { %vm447_vm13 = vmpackc.low %vm223_vm11, %vm222_vm12 }
  0xa8   :  { %448 = vmatpush.bf16.msk.msra.mxu1 %vm447_vm13, %v510_v43  ;;  %471 = vmatpush.bf16.msk.msra.mxu3 %vm447_vm13, %v510_v43 }
  0xac   :  { %v181_v58 = vpop.permute.xlu1 %180 }
  0xad   :  { %vm220_vm15 = vcmp.eq.s32.totalorder %v181_v58, %v651_v38  ;;  %v63_v59 = vpop.permute.xlu0 %62 }
  0xae   :  { %vm449_vm1 = vmpackc.low %vm221_vm14, %vm220_vm15  ;;  %vm100_vm2 = vcmp.eq.s32.totalorder %v63_v59, %v656_v39 }
  0xaf   :  { %vm425_vm3 = vmpackc.low %vm100_vm2, %vm99_vm0  ;;  %450 = vmatpush.bf16.msk.msra.mxu1 %vm449_vm1, %v510_v43  ;;  %472 = vmatpush.bf16.msk.msra.mxu3 %vm449_vm1, %v510_v43 }
  0xb0   :  { %426 = vmatpush.bf16.msk.msra.mxu0 %vm425_vm3, %v510_v43  ;;  %464 = vmatpush.bf16.msk.msra.mxu2 %vm425_vm3, %v510_v43 }
  0xb4   :  { %v57_v61 = vpop.permute.xlu1 %56 }
  0xb5   :  { %vm98_vm4 = vcmp.eq.s32.totalorder %v57_v61, %v656_v39  ;;  %v54_v62 = vpop.permute.xlu0 %53 }
  0xb6   :  { %vm97_vm5 = vcmp.eq.s32.totalorder %v54_v62, %v656_v39 }
  0xb7   :  { %vm427_vm6 = vmpackc.low %vm98_vm4, %vm97_vm5 }
  0xb8   :  { %428 = vmatpush.bf16.msk.msra.mxu0 %vm427_vm6, %v510_v43  ;;  %465 = vmatpush.bf16.msk.msra.mxu2 %vm427_vm6, %v510_v43 }
  0xbc   :  { %v48_v0 = vpop.permute.xlu1 %47 }
  0xbd   :  { %v178_v1 = vpop.permute.xlu0 %177  ;;  %vm95_vm8 = vcmp.eq.s32.totalorder %v48_v0, %v656_v39 }
  0xbe   :  { %vm219_vm10 = vcmp.eq.s32.totalorder %v178_v1, %v651_v38  ;;  %vm429_vm11 = vmpackc.low %vm96_vm7, %vm95_vm8 }
  0xbf   :  { %vm451_vm12 = vmpackc.low %vm219_vm10, %vm218_vm9  ;;  %430 = vmatpush.bf16.msk.msra.mxu0 %vm429_vm11, %v510_v43  ;;  %466 = vmatpush.bf16.msk.msra.mxu2 %vm429_vm11, %v510_v43 }
  0xc0   :  { %452 = vmatpush.bf16.msk.msra.mxu1 %vm451_vm12, %v510_v43  ;;  %473 = vmatpush.bf16.msk.msra.mxu3 %vm451_vm12, %v510_v43 }
  0xc2   :  { %301 = vmatmul.bf16.vlgmr.msra.gmra.mxu2 %v456_v2  ;;  %296 = vmatmul.bf16.vlgmr.msra.gmra.mxu0 %v455_v3 }
  0xc4   :  { %v172_v4 = vpop.permute.xlu1 %171 }
  0xc5   :  { %v169_v5 = vpop.permute.xlu0 %168  ;;  %vm217_vm13 = vcmp.eq.s32.totalorder %v172_v4, %v651_v38 }
  0xc6   :  { %vm216_vm14 = vcmp.eq.s32.totalorder %v169_v5, %v651_v38 }
  0xc7   :  { %vm453_vm15 = vmpackc.low %vm217_vm13, %vm216_vm14 }
  0xc8   :  { %454 = vmatpush.bf16.msk.msra.mxu1 %vm453_vm15, %v510_v43  ;;  %474 = vmatpush.bf16.msk.msra.mxu3 %vm453_vm15, %v510_v43 }
  0xcb   :  { %331 = vmatmul.bf16.vlgmr.msra.gmra.mxu1 %v457_v6  ;;  %336 = vmatmul.bf16.vlgmr.msra.gmra.mxu3 %v458_v7 }
 0x13f   :  { %v297_v8 = vpop.f32.mrf.mxu0 }
 0x145   :  { %v302_v10 = vpop.f32.mrf.mxu2 }
 0x147   :  { %v299_v12 = vpop.f32.mrf.mxu0 }
 0x148   :  { %v332_v9 = vpop.f32.mrf.mxu1 }
 0x149   :  { %v342_v14 = vmul.f32 %v332_v9, %v297_v8 }
 0x14d   :  { %v304_v18 = vpop.f32.mrf.mxu2 }
 0x14e   :  { %v337_v11 = vpop.f32.mrf.mxu3 }
 0x14f   :  { %v344_v17 = vmul.f32 %v337_v11, %v302_v10 }
 0x150   :  { %v334_v13 = vpop.f32.mrf.mxu1 }
 0x151   :  { %v343_v15 = vmul.f32 %v334_v13, %v299_v12 }
 0x153   :  { %v346_v16 = vadd.f32 %v343_v15, %v342_v14 }
 0x155   :  { %v347_v21 = vadd.f32 %v346_v16, %v344_v17 }
 0x156   :  { %v339_v19 = vpop.f32.mrf.mxu3 }
 0x157   :  { %v345_v20 = vmul.f32 %v339_v19, %v304_v18 }
 0x159   :  { %v348_v22 = vadd.f32 %v347_v21, %v345_v20 }
 0x15b   :  { %v349_v23 = vrot.slane %v348_v22, 4 }
 0x15d   :  { %v350_v24 = vadd.f32 %v349_v23, %v348_v22 }
 0x15f   :  { %v351_v25 = vrot.slane %v350_v24, 2 }
 0x161   :  { %v352_v26 = vadd.f32 %v351_v25, %v350_v24 }
 0x163   :  { %v353_v27 = vrot.slane %v352_v26, 1 }
 0x165   :  { %v354_v29 = vadd.f32 %v353_v27, %v352_v26 }
 0x167   :  { %v357_v30 = vadd.f32 %v356_v28, %v354_v29 }
 0x169   :  { %358 = vst [vmem:[#allocation3] sm:$0x1] %v357_v30 }
 0x16a   :  { %369 = dma.vmem_to_hbm [thread:$0]  %s365_s28, 16, %s367_s8, [#allocation4]  }
 0x16b   :  { %507 = dma.done.wait [#allocation4], 16  }
 0x16c   :  { %508 = vsyncadd [#allocation4], 4294967280 }
 0x16d   :  { %374 = vsyncpa [#allocation4], 1 }

// kernel: tpu_custom_call.1
= control target key start
LH: loop header
LB: loop body
LE: loop exit
PB: predicated region body
PF: predicated region fallthrough
CT: control target
= control target key end

     0   :  { %v509_v3 = vmov 0   ;;  %s740_s0 = inlined_call_operand.vmem [shape: s32[1,128], index: 0, kind: input, shape index: {}]   ;;  %s741_s1 = inlined_call_operand.vmem [shape: s32[1,128], index: 1, kind: input, shape index: {}]   ;;  %s742_s2 = inlined_call_operand.vmem [shape: s32[128,1], index: 2, kind: input, shape index: {}]   ;;  %s743_s3 = inlined_call_operand.vmem [shape: s32[128,1], index: 3, kind: input, shape index: {}]   ;;  %s744_s4 = inlined_call_operand.vmem [shape: bf16[32,128], index: 4, kind: input, shape index: {}]   ;;  %s745_s5 = inlined_call_operand.vmem [shape: bf16[32,128], index: 5, kind: input, shape index: {}]   ;;  %s746_s6 = inlined_call_operand.<no memory space> [shape: f32[1,1], index: 6, kind: input, shape index: {}]   ;;  %s747_s7 = inlined_call_operand.hbm [shape: f32[1,128], index: 7, kind: output, shape index: {}]  }
   0x1   :  { %v165_v0 = vld [vmem:[%s743_s3 + $0x70] sm:$0xff]  ;;  %v42_v2 = vld [vmem:[%s742_s2 + $0x60] sm:$0xff]  ;;  %480 = vset.pattern.permute.xlu2 %v509_v3  ;;  %479 = vset.pattern.permute.xlu1 %v509_v3 }
   0x2   :  { %v44_v1 = vld [vmem:[%s742_s2 + $0x70] sm:$0xff]  ;;  %478 = vset.pattern.permute.xlu0 %v509_v3  ;;  %210 = vperm.xlu1 %479, %v165_v0  }
   0x3   :  { %89 = vperm.xlu0 %478, %v44_v1   ;;  %83 = vperm.xlu2 %480, %v42_v2  }
   0x4   :  { %13 = vsyncpa [#allocation4], 0  ;;  %v166_v4 = vld [vmem:[%s743_s3 + $0x78] sm:$0xff]  ;;  %v43_v6 = vld [vmem:[%s742_s2 + $0x68] sm:$0xff]  ;;  %v510_v43 = vmov 1.0|1.0  }
   0x5   :  { %v45_v5 = vld [vmem:[%s742_s2 + $0x78] sm:$0xff]  ;;  %v164_v7 = vld [vmem:[%s743_s3 + $0x68] sm:$0xff]  ;;  %v163_v8 = vld [vmem:[%s743_s3 + $0x60] sm:$0xff]  ;;  %s511_s27 = smov [#allocation3]   ;;  %s366_s8 = sshll.u32 %s747_s7, 4  ;;  %s367_s8 = int_to_ptr.hbm [resolvable:$true] %s366_s8 }
   0x6   :  { %v40_v9 = vld [vmem:[%s742_s2 + $0x50] sm:$0xff]  ;;  %v41_v11 = vld [vmem:[%s742_s2 + $0x58] sm:$0xff]  ;;  %v39_v13 = vld [vmem:[%s742_s2 + $0x48] sm:$0xff]  ;;  %s364_s28 = sshll.u32 %s511_s27, 4  ;;  %s365_s28 = int_to_ptr.vmem [resolvable:$true] %s364_s28 }
   0x7   :  { %v161_v10 = vld [vmem:[%s743_s3 + $0x50] sm:$0xff]  ;;  %v162_v12 = vld [vmem:[%s743_s3 + $0x58] sm:$0xff]  ;;  %v159_v14 = vld [vmem:[%s743_s3 + $0x40] sm:$0xff] }
   0x8   :  { %v38_v15 = vld [vmem:[%s742_s2 + $0x40] sm:$0xff]  ;;  %v36_v16 = vld [vmem:[%s742_s2 + $0x30] sm:$0xff]  ;;  %v160_v17 = vld [vmem:[%s743_s3 + $0x48] sm:$0xff] }
   0x9   :  { %v37_v18 = vld [vmem:[%s742_s2 + $0x38] sm:$0xff]  ;;  %v157_v20 = vld [vmem:[%s743_s3 + $0x30] sm:$0xff]  ;;  %v34_v21 = vld [vmem:[%s742_s2 + $0x20] sm:$0xff] }
   0xa   :  { %213 = vperm.xlu1 %479, %v166_v4   ;;  %v158_v19 = vld [vmem:[%s743_s3 + $0x38] sm:$0xff]  ;;  %v155_v22 = vld [vmem:[%s743_s3 + $0x20] sm:$0xff]  ;;  %v35_v23 = vld [vmem:[%s742_s2 + $0x28] sm:$0xff] }
   0xb   :  { %92 = vperm.xlu0 %478, %v45_v5   ;;  %86 = vperm.xlu2 %480, %v43_v6   ;;  %v156_v24 = vld [vmem:[%s743_s3 + $0x28] sm:$0xff]  ;;  %v33_v25 = vld [vmem:[%s742_s2 + $0x18] sm:$0xff]  ;;  %v153_v26 = vld [vmem:[%s743_s3 + $0x10] sm:$0xff] }
   0xc   :  { %v32_v27 = vld [vmem:[%s742_s2 + $0x10] sm:$0xff]  ;;  %v30_v28 = vld [vmem:[%s742_s2] sm:$0xff]  ;;  %v154_v29 = vld [vmem:[%s743_s3 + $0x18] sm:$0xff] }
   0xd   :  { %v31_v30 = vld [vmem:[%s742_s2 + $0x8] sm:$0xff]  ;;  %v151_v32 = vld [vmem:[%s743_s3] sm:$0xff] }
   0xe   :  { %v152_v31 = vld [vmem:[%s743_s3 + $0x8] sm:$0xff]  ;;  %v651_v38 = vld [vmem:[%s741_s1] ss:$0 sm:$0xff] }
   0xf   :  { %v656_v39 = vld [vmem:[%s740_s0] ss:$0 sm:$0xff]  ;;  %v456_v2 = vld [vmem:[%s744_s4 + $0x8] sm:$0xff] }
  0x10   :  { %v455_v3 = vld [vmem:[%s744_s4] sm:$0xff] }
  0x11   :  { %v457_v6 = vld [vmem:[%s745_s5] sm:$0xff] }
  0x12   :  { %207 = vperm.xlu1 %479, %v164_v7   ;;  %v458_v7 = vld [vmem:[%s745_s5 + $0x8] sm:$0xff] }
  0x13   :  { %204 = vperm.xlu0 %478, %v163_v8   ;;  %77 = vperm.xlu2 %480, %v40_v9  }
  0x1a   :  { %198 = vperm.xlu1 %479, %v161_v10  }
  0x1b   :  { %80 = vperm.xlu0 %478, %v41_v11   ;;  %201 = vperm.xlu2 %480, %v162_v12  }
  0x22   :  { %74 = vperm.xlu1 %479, %v39_v13  }
  0x23   :  { %192 = vperm.xlu2 %480, %v159_v14   ;;  %71 = vperm.xlu0 %478, %v38_v15  }
  0x2a   :  { %65 = vperm.xlu1 %479, %v36_v16  }
  0x2b   :  { %195 = vperm.xlu0 %478, %v160_v17   ;;  %68 = vperm.xlu2 %480, %v37_v18  }
  0x32   :  { %189 = vperm.xlu1 %479, %v158_v19  }
  0x33   :  { %186 = vperm.xlu0 %478, %v157_v20   ;;  %59 = vperm.xlu2 %480, %v34_v21  }
  0x3a   :  { %180 = vperm.xlu1 %479, %v155_v22  }
  0x3b   :  { %62 = vperm.xlu0 %478, %v35_v23   ;;  %183 = vperm.xlu2 %480, %v156_v24  }
  0x42   :  { %56 = vperm.xlu1 %479, %v33_v25  }
  0x43   :  { %174 = vperm.xlu2 %480, %v153_v26   ;;  %53 = vperm.xlu0 %478, %v32_v27  }
  0x4a   :  { %47 = vperm.xlu1 %479, %v30_v28   ;;  %v356_v28 = vstv %s746_s6 }
  0x4b   :  { %177 = vperm.xlu0 %478, %v154_v29   ;;  %50 = vperm.xlu2 %480, %v31_v30  }
  0x52   :  { %171 = vperm.xlu1 %479, %v152_v31  }
  0x53   :  { %168 = vperm.xlu0 %478, %v151_v32  }
  0x5d   :  { %v84_v33 = vpop.permute.xlu2 %83 }
  0x5e   :  { %vm107_vm6 = vcmp.eq.s32.totalorder %v84_v33, %v656_v39 }
  0x65   :  { %v87_v34 = vpop.permute.xlu2 %86 }
  0x66   :  { %vm108_vm7 = vcmp.eq.s32.totalorder %v87_v34, %v656_v39 }
  0x67   :  { %vm417_vm8 = vmpackc.low %vm108_vm7, %vm107_vm6 }
  0x6d   :  { %v78_v35 = vpop.permute.xlu2 %77 }
  0x6e   :  { %vm105_vm14 = vcmp.eq.s32.totalorder %v78_v35, %v656_v39 }
  0x74   :  { %v211_v36 = vpop.permute.xlu1 %210 }
  0x75   :  { %v90_v37 = vpop.permute.xlu0 %89  ;;  %vm230_vm0 = vcmp.eq.s32.totalorder %v211_v36, %v651_v38  ;;  %v202_v42 = vpop.permute.xlu2 %201 }
  0x76   :  { %vm109_vm2 = vcmp.eq.s32.totalorder %v90_v37, %v656_v39  ;;  %vm227_vm12 = vcmp.eq.s32.totalorder %v202_v42, %v651_v38 }
  0x7c   :  { %v214_v40 = vpop.permute.xlu1 %213 }
  0x7d   :  { %vm231_vm1 = vcmp.eq.s32.totalorder %v214_v40, %v651_v38  ;;  %v93_v41 = vpop.permute.xlu0 %92  ;;  %v193_v46 = vpop.permute.xlu2 %192 }
  0x7e   :  { %vm110_vm3 = vcmp.eq.s32.totalorder %v93_v41, %v656_v39  ;;  %vm439_vm4 = vmpackc.low %vm231_vm1, %vm230_vm0  ;;  %vm224_vm7 = vcmp.eq.s32.totalorder %v193_v46, %v651_v38 }
  0x7f   :  { %vm415_vm5 = vmpackc.low %vm110_vm3, %vm109_vm2  ;;  %440 = vmatpush.bf16.msk.msra.mxu1 %vm439_vm4, %v510_v43  ;;  %467 = vmatpush.bf16.msk.msra.mxu3 %vm439_vm4, %v510_v43 }
  0x80   :  { %416 = vmatpush.bf16.msk.msra.mxu0 %vm415_vm5, %v510_v43  ;;  %459 = vmatpush.bf16.msk.msra.mxu2 %vm415_vm5, %v510_v43 }
  0x84   :  { %418 = vmatpush.bf16.msk.msra.mxu0 %vm417_vm8, %v510_v43  ;;  %460 = vmatpush.bf16.msk.msra.mxu2 %vm417_vm8, %v510_v43  ;;  %v208_v44 = vpop.permute.xlu1 %207 }
  0x85   :  { %vm229_vm9 = vcmp.eq.s32.totalorder %v208_v44, %v651_v38  ;;  %v205_v45 = vpop.permute.xlu0 %204  ;;  %v69_v49 = vpop.permute.xlu2 %68 }
  0x86   :  { %vm228_vm10 = vcmp.eq.s32.totalorder %v205_v45, %v651_v38  ;;  %vm102_vm5 = vcmp.eq.s32.totalorder %v69_v49, %v656_v39 }
  0x87   :  { %vm441_vm11 = vmpackc.low %vm229_vm9, %vm228_vm10 }
  0x88   :  { %442 = vmatpush.bf16.msk.msra.mxu1 %vm441_vm11, %v510_v43  ;;  %468 = vmatpush.bf16.msk.msra.mxu3 %vm441_vm11, %v510_v43 }
  0x8c   :  { %v199_v47 = vpop.permute.xlu1 %198 }
  0x8d   :  { %vm226_vm13 = vcmp.eq.s32.totalorder %v199_v47, %v651_v38  ;;  %v81_v48 = vpop.permute.xlu0 %80  ;;  %v60_v52 = vpop.permute.xlu2 %59 }
  0x8e   :  { %vm443_vm15 = vmpackc.low %vm227_vm12, %vm226_vm13  ;;  %vm106_vm0 = vcmp.eq.s32.totalorder %v81_v48, %v656_v39 }
  0x8f   :  { %vm419_vm1 = vmpackc.low %vm106_vm0, %vm105_vm14  ;;  %444 = vmatpush.bf16.msk.msra.mxu1 %vm443_vm15, %v510_v43  ;;  %469 = vmatpush.bf16.msk.msra.mxu3 %vm443_vm15, %v510_v43  ;;  %vm99_vm0 = vcmp.eq.s32.totalorder %v60_v52, %v656_v39 }
  0x90   :  { %420 = vmatpush.bf16.msk.msra.mxu0 %vm419_vm1, %v510_v43  ;;  %461 = vmatpush.bf16.msk.msra.mxu2 %vm419_vm1, %v510_v43 }
  0x94   :  { %v75_v50 = vpop.permute.xlu1 %74 }
  0x95   :  { %vm104_vm2 = vcmp.eq.s32.totalorder %v75_v50, %v656_v39  ;;  %v72_v51 = vpop.permute.xlu0 %71  ;;  %v184_v57 = vpop.permute.xlu2 %183 }
  0x96   :  { %vm103_vm3 = vcmp.eq.s32.totalorder %v72_v51, %v656_v39  ;;  %vm221_vm14 = vcmp.eq.s32.totalorder %v184_v57, %v651_v38 }
  0x97   :  { %vm421_vm4 = vmpackc.low %vm104_vm2, %vm103_vm3 }
  0x98   :  { %422 = vmatpush.bf16.msk.msra.mxu0 %vm421_vm4, %v510_v43  ;;  %462 = vmatpush.bf16.msk.msra.mxu2 %vm421_vm4, %v510_v43 }
  0x9c   :  { %v66_v53 = vpop.permute.xlu1 %65 }
  0x9d   :  { %v196_v54 = vpop.permute.xlu0 %195  ;;  %vm101_vm6 = vcmp.eq.s32.totalorder %v66_v53, %v656_v39  ;;  %v175_v60 = vpop.permute.xlu2 %174 }
  0x9e   :  { %vm225_vm8 = vcmp.eq.s32.totalorder %v196_v54, %v651_v38  ;;  %vm423_vm9 = vmpackc.low %vm102_vm5, %vm101_vm6 }
  0x9f   :  { %vm445_vm10 = vmpackc.low %vm225_vm8, %vm224_vm7  ;;  %424 = vmatpush.bf16.msk.msra.mxu0 %vm423_vm9, %v510_v43  ;;  %463 = vmatpush.bf16.msk.msra.mxu2 %vm423_vm9, %v510_v43  ;;  %vm218_vm9 = vcmp.eq.s32.totalorder %v175_v60, %v651_v38 }
  0xa0   :  { %446 = vmatpush.bf16.msk.msra.mxu1 %vm445_vm10, %v510_v43  ;;  %470 = vmatpush.bf16.msk.msra.mxu3 %vm445_vm10, %v510_v43 }
  0xa4   :  { %v190_v55 = vpop.permute.xlu1 %189 }
  0xa5   :  { %v187_v56 = vpop.permute.xlu0 %186  ;;  %vm223_vm11 = vcmp.eq.s32.totalorder %v190_v55, %v651_v38  ;;  %v51_v63 = vpop.permute.xlu2 %50 }
  0xa6   :  { %vm222_vm12 = vcmp.eq.s32.totalorder %v187_v56, %v651_v38  ;;  %vm96_vm7 = vcmp.eq.s32.totalorder %v51_v63, %v656_v39 }
  0xa7   :  { %vm447_vm13 = vmpackc.low %vm223_vm11, %vm222_vm12 }
  0xa8   :  { %448 = vmatpush.bf16.msk.msra.mxu1 %vm447_vm13, %v510_v43  ;;  %471 = vmatpush.bf16.msk.msra.mxu3 %vm447_vm13, %v510_v43 }
  0xac   :  { %v181_v58 = vpop.permute.xlu1 %180 }
  0xad   :  { %vm220_vm15 = vcmp.eq.s32.totalorder %v181_v58, %v651_v38  ;;  %v63_v59 = vpop.permute.xlu0 %62 }
  0xae   :  { %vm449_vm1 = vmpackc.low %vm221_vm14, %vm220_vm15  ;;  %vm100_vm2 = vcmp.eq.s32.totalorder %v63_v59, %v656_v39 }
  0xaf   :  { %vm425_vm3 = vmpackc.low %vm100_vm2, %vm99_vm0  ;;  %450 = vmatpush.bf16.msk.msra.mxu1 %vm449_vm1, %v510_v43  ;;  %472 = vmatpush.bf16.msk.msra.mxu3 %vm449_vm1, %v510_v43 }
  0xb0   :  { %426 = vmatpush.bf16.msk.msra.mxu0 %vm425_vm3, %v510_v43  ;;  %464 = vmatpush.bf16.msk.msra.mxu2 %vm425_vm3, %v510_v43 }
  0xb4   :  { %v57_v61 = vpop.permute.xlu1 %56 }
  0xb5   :  { %vm98_vm4 = vcmp.eq.s32.totalorder %v57_v61, %v656_v39  ;;  %v54_v62 = vpop.permute.xlu0 %53 }
  0xb6   :  { %vm97_vm5 = vcmp.eq.s32.totalorder %v54_v62, %v656_v39 }
  0xb7   :  { %vm427_vm6 = vmpackc.low %vm98_vm4, %vm97_vm5 }
  0xb8   :  { %428 = vmatpush.bf16.msk.msra.mxu0 %vm427_vm6, %v510_v43  ;;  %465 = vmatpush.bf16.msk.msra.mxu2 %vm427_vm6, %v510_v43 }
  0xbc   :  { %v48_v0 = vpop.permute.xlu1 %47 }
  0xbd   :  { %v178_v1 = vpop.permute.xlu0 %177  ;;  %vm95_vm8 = vcmp.eq.s32.totalorder %v48_v0, %v656_v39 }
  0xbe   :  { %vm219_vm10 = vcmp.eq.s32.totalorder %v178_v1, %v651_v38  ;;  %vm429_vm11 = vmpackc.low %vm96_vm7, %vm95_vm8 }
  0xbf   :  { %vm451_vm12 = vmpackc.low %vm219_vm10, %vm218_vm9  ;;  %430 = vmatpush.bf16.msk.msra.mxu0 %vm429_vm11, %v510_v43  ;;  %466 = vmatpush.bf16.msk.msra.mxu2 %vm429_vm11, %v510_v43 }
  0xc0   :  { %452 = vmatpush.bf16.msk.msra.mxu1 %vm451_vm12, %v510_v43  ;;  %473 = vmatpush.bf16.msk.msra.mxu3 %vm451_vm12, %v510_v43 }
  0xc2   :  { %301 = vmatmul.bf16.vlgmr.msra.gmra.mxu2 %v456_v2  ;;  %296 = vmatmul.bf16.vlgmr.msra.gmra.mxu0 %v455_v3 }
  0xc4   :  { %v172_v4 = vpop.permute.xlu1 %171 }
  0xc5   :  { %v169_v5 = vpop.permute.xlu0 %168  ;;  %vm217_vm13 = vcmp.eq.s32.totalorder %v172_v4, %v651_v38 }
  0xc6   :  { %vm216_vm14 = vcmp.eq.s32.totalorder %v169_v5, %v651_v38 }
  0xc7   :  { %vm453_vm15 = vmpackc.low %vm217_vm13, %vm216_vm14 }
  0xc8   :  { %454 = vmatpush.bf16.msk.msra.mxu1 %vm453_vm15, %v510_v43  ;;  %474 = vmatpush.bf16.msk.msra.mxu3 %vm453_vm15, %v510_v43 }
  0xcb   :  { %331 = vmatmul.bf16.vlgmr.msra.gmra.mxu1 %v457_v6  ;;  %336 = vmatmul.bf16.vlgmr.msra.gmra.mxu3 %v458_v7 }
 0x13f   :  { %v297_v8 = vpop.f32.mrf.mxu0 }
 0x145   :  { %v302_v10 = vpop.f32.mrf.mxu2 }
 0x147   :  { %v299_v12 = vpop.f32.mrf.mxu0 }
 0x148   :  { %v332_v9 = vpop.f32.mrf.mxu1 }
 0x149   :  { %v342_v14 = vmul.f32 %v332_v9, %v297_v8 }
 0x14d   :  { %v304_v18 = vpop.f32.mrf.mxu2 }
 0x14e   :  { %v337_v11 = vpop.f32.mrf.mxu3 }
 0x14f   :  { %v344_v17 = vmul.f32 %v337_v11, %v302_v10 }
 0x150   :  { %v334_v13 = vpop.f32.mrf.mxu1 }
 0x151   :  { %v343_v15 = vmul.f32 %v334_v13, %v299_v12 }
 0x153   :  { %v346_v16 = vadd.f32 %v343_v15, %v342_v14 }
 0x155   :  { %v347_v21 = vadd.f32 %v346_v16, %v344_v17 }
 0x156   :  { %v339_v19 = vpop.f32.mrf.mxu3 }
 0x157   :  { %v345_v20 = vmul.f32 %v339_v19, %v304_v18 }
 0x159   :  { %v348_v22 = vadd.f32 %v347_v21, %v345_v20 }
 0x15b   :  { %v349_v23 = vrot.slane %v348_v22, 4 }
 0x15d   :  { %v350_v24 = vadd.f32 %v349_v23, %v348_v22 }
 0x15f   :  { %v351_v25 = vrot.slane %v350_v24, 2 }
 0x161   :  { %v352_v26 = vadd.f32 %v351_v25, %v350_v24 }
 0x163   :  { %v353_v27 = vrot.slane %v352_v26, 1 }
 0x165   :  { %v354_v29 = vadd.f32 %v353_v27, %v352_v26 }
 0x167   :  { %v357_v30 = vadd.f32 %v356_v28, %v354_v29 }
 0x169   :  { %358 = vst [vmem:[#allocation3] sm:$0x1] %v357_v30 }
 0x16a   :  { %369 = dma.vmem_to_hbm [thread:$0]  %s365_s28, 16, %s367_s8, [#allocation4]  }
 0x16b   :  { %507 = dma.done.wait [#allocation4], 16  }
 0x16c   :  { %508 = vsyncadd [#allocation4], 4294967280 }
 0x16d   :  { %374 = vsyncpa [#allocation4], 1 }

</bundles_post_ra>
